<compile_context>
chip_gen: v5e
topology: v5e:2x2
jax: 0.10.0
libtpu: 0.0.40
codegen_flags: <defaults>
</compile_context>

<pallas_src>
import math
import numpy as np
import jax
import jax.numpy as jnp
from jax.experimental import pallas as pl
from jax.experimental.pallas import tpu as pltpu

# ----------------------------- config (small) --------------------------------
SAMPLE_RATE = 1000
WINDOW_SIZE = 64          # n_fft = win_length
HOP_SIZE = 16
MEL_BINS = 8
FMIN = 0.0
FMAX = 500.0              # sr / 2
AMIN = 1e-10
BN_EPS = 1e-5
DATA_LEN = 160
BATCH = 2

N_FFT = WINDOW_SIZE
FREQ_BINS = N_FFT // 2 + 1      # 33
STACK_PAD = 128                 # real(33)+imag(33) stacked, zero-padded to 128
LANE_TILE = 128                 # frame rows sit on the lane axis


# --------------------- deterministic parameter construction ------------------
def _hann_periodic(n):
    # scipy.signal.get_window('hann', n, fftbins=True)
    k = np.arange(n, dtype=np.float64)
    return 0.5 - 0.5 * np.cos(2.0 * np.pi * k / n)


def _hz_to_mel(freqs):
    # librosa slaney scale
    freqs = np.atleast_1d(np.asarray(freqs, dtype=np.float64)).copy()
    f_sp = 200.0 / 3
    mels = freqs / f_sp
    min_log_hz = 1000.0
    min_log_mel = min_log_hz / f_sp
    logstep = np.log(6.4) / 27.0
    t = freqs >= min_log_hz
    mels[t] = min_log_mel + np.log(freqs[t] / min_log_hz) / logstep
    return mels


def _mel_to_hz(mels):
    mels = np.atleast_1d(np.asarray(mels, dtype=np.float64)).copy()
    f_sp = 200.0 / 3
    freqs = f_sp * mels
    min_log_hz = 1000.0
    min_log_mel = min_log_hz / f_sp
    logstep = np.log(6.4) / 27.0
    t = mels >= min_log_mel
    freqs[t] = min_log_hz * np.exp(logstep * (mels[t] - min_log_mel))
    return freqs


def _mel_filterbank(sr, n_fft, n_mels, fmin, fmax):
    # librosa.filters.mel(htk=False, norm='slaney') -> (n_mels, n_fft//2+1)
    n_freqs = n_fft // 2 + 1
    fftfreqs = np.linspace(0.0, sr / 2.0, n_freqs)
    mel_pts = _mel_to_hz(np.linspace(_hz_to_mel(fmin)[0], _hz_to_mel(fmax)[0],
                                     n_mels + 2))
    fdiff = np.diff(mel_pts)
    ramps = mel_pts[:, None] - fftfreqs[None, :]
    weights = np.zeros((n_mels, n_freqs), dtype=np.float64)
    for i in range(n_mels):
        lower = -ramps[i] / fdiff[i]
        upper = ramps[i + 2] / fdiff[i + 1]
        weights[i] = np.maximum(0.0, np.minimum(lower, upper))
    enorm = 2.0 / (mel_pts[2:n_mels + 2] - mel_pts[:n_mels])
    weights *= enorm[:, None]
    return weights


def build_weights():
    """Raw (unfused) weights + BN fold, all as numpy (compile-time)."""
    window = _hann_periodic(WINDOW_SIZE)           # win_length == n_fft
    n = np.arange(N_FFT)
    dft = np.exp(-2j * np.pi * np.outer(n, n) / N_FFT)[:, :FREQ_BINS]
    w_real = (np.real(dft) * window[:, None]).astype(np.float32)   # (n_fft, F)
    w_imag = (np.imag(dft) * window[:, None]).astype(np.float32)   # (n_fft, F)
    mel_w = _mel_filterbank(SAMPLE_RATE, N_FFT, MEL_BINS,
                            FMIN, FMAX).astype(np.float32)          # (M, F)

    # BatchNorm2d(mel_bins), init_bn -> weight=1, bias=0; running mean/var 0/1
    gamma = np.ones((MEL_BINS,), np.float32)
    beta = np.zeros((MEL_BINS,), np.float32)
    run_mean = np.zeros((MEL_BINS,), np.float32)
    run_var = np.ones((MEL_BINS,), np.float32)
    scale = (gamma / np.sqrt(run_var + BN_EPS)).astype(np.float32)
    shift = (beta - run_mean * scale).astype(np.float32)
    return w_real, w_imag, mel_w, scale, shift


def build_fused_params():
    """Fused / transposed weights for the Pallas kernel."""
    w_real, w_imag, mel_w, scale, shift = build_weights()

    # Stacked DFT weight, transposed: rows 0..32 real, 33..65 imag, rest zero.
    w_stacked_t = np.zeros((STACK_PAD, N_FFT), np.float32)
    w_stacked_t[:FREQ_BINS, :] = w_real.T
    w_stacked_t[FREQ_BINS:2 * FREQ_BINS, :] = w_imag.T

    # Mel weights duplicated over the real/imag halves -> second matmul yields
    # real^2 + imag^2 mel power directly.
    mel_stacked_t = np.zeros((MEL_BINS, STACK_PAD), np.float32)
    mel_stacked_t[:, :FREQ_BINS] = mel_w
    mel_stacked_t[:, FREQ_BINS:2 * FREQ_BINS] = mel_w

    log_scale = (10.0 / math.log(10.0)) * scale    # BN scale folded into log
    return (jnp.asarray(w_stacked_t), jnp.asarray(mel_stacked_t),
            log_scale, shift)


# ------------------------------- Pallas kernel --------------------------------
def _make_kernel(log_scale, shift):
    """log_scale/shift are Python scalars (uniform under init_bn, eval stats)."""
    def kernel(framesT_ref, wT_ref, melT_ref, outT_ref):
        # One fused DFT matmul: (128, n_fft) @ (n_fft, 128)
        #   rows 0..32 -> real part, 33..65 -> imag part, rest zero.
        stacked = jnp.dot(wT_ref[...], framesT_ref[...],
                          preferred_element_type=jnp.float32)
        power = stacked * stacked
        # (MEL_BINS, 128) @ (128, 128) -> mel power spectrogram, transposed.
        mel = jnp.dot(melT_ref[...], power, preferred_element_type=jnp.float32)
        # power_to_db (ref=1, amin=1e-10, top_db=None) with BN folded in:
        # single unmasked (8, 128) vreg store.
        outT_ref[...] = jnp.log(jnp.maximum(mel, AMIN)) * log_scale + shift
    return kernel


def tl_logmel(x):
    """x: (B, L) float32 -> (B, 1, T, MEL_BINS) float32"""
    wT, melT, log_scale_vec, shift_vec = build_fused_params()
    # init_bn + default running stats -> uniform scale, zero shift; bake scalars.
    # TODO(synk): trained per-channel BN stats would be folded the same way and
    # passed as a (MEL_BINS, 1) kernel input instead of baked scalars.
    log_scale = float(log_scale_vec[0])
    shift = float(shift_vec[0])

    B, L = x.shape
    pad = N_FFT // 2
    # center=True, pad_mode='reflect'
    xp = jnp.pad(x, ((0, 0), (pad, pad)), mode="reflect")
    T = (L + 2 * pad - N_FFT) // HOP_SIZE + 1

    # TODO(synk): for production-sized inputs move this overlapping frame
    # gather (4x redundant HBM traffic) into the kernel via pl.ds windows on xp.
    idx = jnp.arange(T)[:, None] * HOP_SIZE + jnp.arange(N_FFT)[None, :]
    frames = xp[:, idx].reshape(B * T, N_FFT).astype(jnp.float32)   # (B*T, n_fft)

    rows = B * T
    rows_pad = ((rows + LANE_TILE - 1) // LANE_TILE) * LANE_TILE
    # Transpose so frame rows sit on the 128-lane axis (lane-dense output).
    framesT = jnp.pad(frames, ((0, rows_pad - rows), (0, 0))).T     # (n_fft, rows_pad)

    num_tiles = rows_pad // LANE_TILE          # == 1 at this size
    kernel = _make_kernel(log_scale, shift)

    outT = pl.pallas_call(
        kernel,
        out_shape=jax.ShapeDtypeStruct((MEL_BINS, rows_pad), jnp.float32),
        grid_spec=pltpu.PrefetchScalarGridSpec(
            num_scalar_prefetch=0,
            grid=(num_tiles,),
            in_specs=[
                pl.BlockSpec((N_FFT, LANE_TILE), lambda i: (0, i)),
                pl.BlockSpec((STACK_PAD, N_FFT), lambda i: (0, 0)),
                pl.BlockSpec((MEL_BINS, STACK_PAD), lambda i: (0, 0)),
            ],
            out_specs=pl.BlockSpec((MEL_BINS, LANE_TILE), lambda i: (0, i)),
        ),
        compiler_params=pltpu.CompilerParams(
            dimension_semantics=("parallel",)),
    )(framesT, wT, melT)

    out = outT[:, :rows].T.reshape(B, T, MEL_BINS)
    return out[:, None, :, :]                      # (B, 1, T, M)


# ------------------------------- reference ------------------------------------
def tl_logmel_ref(x):
    """Unfused pure-JAX reference (separate real/imag matmuls, explicit BN)."""
    w_real, w_imag, mel_w, scale, shift = build_weights()
    B, L = x.shape
    pad = N_FFT // 2
    xp = jnp.pad(x, ((0, 0), (pad, pad)), mode="reflect")
    T = (L + 2 * pad - N_FFT) // HOP_SIZE + 1
    idx = jnp.arange(T)[:, None] * HOP_SIZE + jnp.arange(N_FFT)[None, :]
    frames = xp[:, idx].astype(jnp.float32)                # (B, T, n_fft)
    real = jnp.einsum("btn,nf->btf", frames, jnp.asarray(w_real))
    imag = jnp.einsum("btn,nf->btf", frames, jnp.asarray(w_imag))
    power = real * real + imag * imag
    mel = jnp.einsum("btf,mf->btm", power, jnp.asarray(mel_w))
    logmel = 10.0 * jnp.log10(jnp.maximum(mel, AMIN))
    y = (logmel * jnp.asarray(scale)[None, None, :]
         + jnp.asarray(shift)[None, None, :])
    return y[:, None, :, :]


if __name__ == "__main__":
    key = jax.random.PRNGKey(0)
    x = jax.random.normal(key, (BATCH, DATA_LEN), dtype=jnp.float32)

    out = jax.block_until_ready(tl_logmel(x))
    ref = jax.block_until_ready(tl_logmel_ref(x))

    expected_T = (DATA_LEN + 2 * (N_FFT // 2) - N_FFT) // HOP_SIZE + 1
    assert out.shape == (BATCH, 1, expected_T, MEL_BINS), out.shape
    np.testing.assert_allclose(np.asarray(out), np.asarray(ref),
                               rtol=1e-4, atol=1e-4)
    print("KERNEL_OK")
</pallas_src>

<mosaic_0001>
module attributes {stable_mosaic.version = 11 : i64} {
  func.func @kernel(%arg0: i32, %arg1: memref<64x128xf32, #tpu.memory_space<vmem>>, %arg2: memref<128x64xf32, #tpu.memory_space<vmem>>, %arg3: memref<8x128xf32, #tpu.memory_space<vmem>>, %arg4: memref<8x128xf32, #tpu.memory_space<vmem>>) attributes {dimension_semantics = [#tpu.dimension_semantics<parallel>], iteration_bounds = array<i64: 1>, scalar_prefetch = 0 : i64, scratch_operands = 0 : i64, tpu.core_type = #tpu.core_type<tc>, window_params = [{transform_indices = @transform_0, window_bounds = array<i64: 64, 128>}, {pipeline_mode = #tpu.pipeline_mode<synchronous>, transform_indices = @transform_1, window_bounds = array<i64: 128, 64>}, {pipeline_mode = #tpu.pipeline_mode<synchronous>, transform_indices = @transform_2, window_bounds = array<i64: 8, 128>}, {transform_indices = @transform_3, window_bounds = array<i64: 8, 128>}]} {
    %c0 = arith.constant 0 : index
    %c0_0 = arith.constant 0 : index
    %0 = vector.load %arg2[%c0, %c0_0] : memref<128x64xf32, #tpu.memory_space<vmem>>, vector<128x64xf32>
    %c0_1 = arith.constant 0 : index
    %c0_2 = arith.constant 0 : index
    %1 = vector.load %arg1[%c0_1, %c0_2] : memref<64x128xf32, #tpu.memory_space<vmem>>, vector<64x128xf32>
    %cst = arith.constant dense<0.000000e+00> : vector<128x128xf32>
    %2 = tpu.matmul %0, %1, %cst {dimension_numbers = #tpu.dot_dimension_numbers<[1], [0], [0], [1], [0, 0, 1, 1], [], []>} : vector<128x64xf32>, vector<64x128xf32>, vector<128x128xf32> -> vector<128x128xf32>
    %3 = arith.mulf %2, %2 : vector<128x128xf32>
    %c0_3 = arith.constant 0 : index
    %c0_4 = arith.constant 0 : index
    %4 = vector.load %arg3[%c0_3, %c0_4] : memref<8x128xf32, #tpu.memory_space<vmem>>, vector<8x128xf32>
    %cst_5 = arith.constant dense<0.000000e+00> : vector<8x128xf32>
    %5 = tpu.matmul %4, %3, %cst_5 {dimension_numbers = #tpu.dot_dimension_numbers<[1], [0], [0], [1], [0, 0, 1, 1], [], []>} : vector<8x128xf32>, vector<128x128xf32>, vector<8x128xf32> -> vector<8x128xf32>
    %cst_6 = arith.constant 1.000000e-10 : f32
    %6 = vector.broadcast %cst_6 : f32 to vector<8x128xf32>
    %7 = arith.maximumf %5, %6 : vector<8x128xf32>
    %8 = math.log %7 : vector<8x128xf32>
    %cst_7 = arith.constant 4.34292269 : f32
    %9 = vector.broadcast %cst_7 : f32 to vector<8x128xf32>
    %10 = arith.mulf %8, %9 : vector<8x128xf32>
    %cst_8 = arith.constant 0.000000e+00 : f32
    %11 = vector.broadcast %cst_8 : f32 to vector<8x128xf32>
    %12 = arith.addf %10, %11 : vector<8x128xf32>
    %c0_9 = arith.constant 0 : index
    %c0_10 = arith.constant 0 : index
    %13 = vector.load %arg4[%c0_9, %c0_10] : memref<8x128xf32, #tpu.memory_space<vmem>>, vector<8x128xf32>
    tpu.vector_store %arg4[%c0_9, %c0_10], %12 {strides = array<i32>} : memref<8x128xf32, #tpu.memory_space<vmem>>, vector<8x128xf32>,
    return
  }
  func.func @transform_0(%arg0: i32) -> (i32, i32) {
    %c0_i32 = arith.constant 0 : i32
    %c0_i32_0 = arith.constant 0 : i32
    return %c0_i32, %arg0 : i32, i32
  }
  func.func @transform_1(%arg0: i32) -> (i32, i32) {
    %c0_i32 = arith.constant 0 : i32
    %c0_i32_0 = arith.constant 0 : i32
    %c0_i32_1 = arith.constant 0 : i32
    return %c0_i32, %c0_i32_0 : i32, i32
  }
  func.func @transform_2(%arg0: i32) -> (i32, i32) {
    %c0_i32 = arith.constant 0 : i32
    %c0_i32_0 = arith.constant 0 : i32
    %c0_i32_1 = arith.constant 0 : i32
    return %c0_i32, %c0_i32_0 : i32, i32
  }
  func.func @transform_3(%arg0: i32) -> (i32, i32) {
    %c0_i32 = arith.constant 0 : i32
    %c0_i32_0 = arith.constant 0 : i32
    return %c0_i32, %arg0 : i32, i32
  }
}

</mosaic_0001>

<bundles_post_ra>
// kernel: tpu_custom_call.1
= control target key start
LH: loop header
LB: loop body
LE: loop exit
PB: predicated region body
PF: predicated region fallthrough
CT: control target
= control target key end

     0   :  { %s388_s0 = inlined_call_operand.vmem [shape: f32[64,128], index: 0, kind: input, shape index: {}]   ;;  %s389_s1 = inlined_call_operand.vmem [shape: f32[128,64], index: 1, kind: input, shape index: {}]   ;;  %s390_s2 = inlined_call_operand.vmem [shape: f32[8,128], index: 2, kind: input, shape index: {}]   ;;  %s391_s3 = inlined_call_operand.hbm [shape: f32[8,128], index: 3, kind: output, shape index: {}]  }
   0x1   :  { %v38_v0 = vld [vmem:[%s388_s0 + $0x38] sm:$0xff]  ;;  %v37_v1 = vld [vmem:[%s388_s0 + $0x30] sm:$0xff]  ;;  %v36_v2 = vld [vmem:[%s388_s0 + $0x28] sm:$0xff] }
   0x2   :  { %229 = vmatpush.msra.mxu3 %v38_v0  ;;  %228 = vmatpush.msra.mxu2 %v38_v0  ;;  %v35_v3 = vld [vmem:[%s388_s0 + $0x20] sm:$0xff] }
   0x3   :  { %96 = vmatpush.msra.mxu0 %v38_v0 }
   0x4   :  { %231 = vmatpush.msra.mxu3 %v37_v1  ;;  %230 = vmatpush.msra.mxu2 %v37_v1 }
   0x5   :  { %97 = vmatpush.msra.mxu0 %v37_v1 }
   0x6   :  { %8 = vsyncpa [#allocation3], 0  ;;  %233 = vmatpush.msra.mxu3 %v36_v2  ;;  %232 = vmatpush.msra.mxu2 %v36_v2  ;;  %v34_v4 = vld [vmem:[%s388_s0 + $0x18] sm:$0xff]  ;;  %v33_v5 = vld [vmem:[%s388_s0 + $0x10] sm:$0xff]  ;;  %vm39_vm0 = vcmask 523264   ;;  %s273_s5 = smov [#allocation2]  }
   0x7   :  { %98 = vmatpush.msra.mxu0 %v36_v2  ;;  %v32_v6 = vld [vmem:[%s388_s0 + $0x8] sm:$0xff]  ;;  %v31_v7 = vld [vmem:[%s388_s0] sm:$0xff]  ;;  %v25_v8 = vld [vmem:[%s389_s1 + $0x50] sm:$0xff]  ;;  %s201_s6 = sshll.u32 %s273_s5, 4  ;;  %s203_s9 = sshll.u32 %s391_s3, 4  ;;  %s202_s6 = int_to_ptr.vmem [resolvable:$true] %s201_s6  ;;  %s204_s9 = int_to_ptr.hbm [resolvable:$true] %s203_s9 }
   0x8   :  { %235 = vmatpush.msra.mxu3 %v35_v3  ;;  %234 = vmatpush.msra.mxu2 %v35_v3  ;;  %v20_v9 = vld [vmem:[%s389_s1 + $0x28] sm:$0xff]  ;;  %v15_v10 = vld [vmem:[%s389_s1] sm:$0xff]  ;;  %v26_v11 = vld [vmem:[%s389_s1 + $0x58] sm:$0xff] }
   0x9   :  { %99 = vmatpush.msra.mxu0 %v35_v3  ;;  %v21_v12 = vld [vmem:[%s389_s1 + $0x30] sm:$0xff]  ;;  %v16_v13 = vld [vmem:[%s389_s1 + $0x8] sm:$0xff]  ;;  %v27_v14 = vld [vmem:[%s389_s1 + $0x60] sm:$0xff] }
   0xa   :  { %237 = vmatpush.msra.mxu3 %v34_v4  ;;  %236 = vmatpush.msra.mxu2 %v34_v4  ;;  %v22_v15 = vld [vmem:[%s389_s1 + $0x38] sm:$0xff]  ;;  %v17_v16 = vld [vmem:[%s389_s1 + $0x10] sm:$0xff]  ;;  %v28_v17 = vld [vmem:[%s389_s1 + $0x68] sm:$0xff] }
   0xb   :  { %100 = vmatpush.msra.mxu0 %v34_v4  ;;  %v23_v18 = vld [vmem:[%s389_s1 + $0x40] sm:$0xff]  ;;  %v18_v19 = vld [vmem:[%s389_s1 + $0x18] sm:$0xff]  ;;  %v29_v20 = vld [vmem:[%s389_s1 + $0x70] sm:$0xff] }
   0xc   :  { %239 = vmatpush.msra.mxu3 %v33_v5  ;;  %238 = vmatpush.msra.mxu2 %v33_v5  ;;  %v24_v21 = vld [vmem:[%s389_s1 + $0x48] sm:$0xff]  ;;  %v19_v22 = vld [vmem:[%s389_s1 + $0x20] sm:$0xff]  ;;  %v30_v23 = vld [vmem:[%s389_s1 + $0x78] sm:$0xff] }
   0xd   :  { %101 = vmatpush.msra.mxu0 %v33_v5  ;;  %v169_v56 = vld [vmem:[%s390_s2] sm:$0xff] }
   0xe   :  { %241 = vmatpush.msra.mxu3 %v32_v6  ;;  %240 = vmatpush.msra.mxu2 %v32_v6 }
   0xf   :  { %102 = vmatpush.msra.mxu0 %v32_v6 }
  0x10   :  { %243 = vmatpush.msra.mxu3 %v31_v7  ;;  %242 = vmatpush.msra.mxu2 %v31_v7 }
  0x11   :  { %222 = vmatmul.msk.f32.vlgmr.msra.gmra.mxu3 %vm39_vm0, %v25_v8  ;;  %217 = vmatmul.msk.f32.vlgmr.msra.gmra.mxu2 %vm39_vm0, %v20_v9 }
  0x12   :  { %103 = vmatpush.msra.mxu0 %v31_v7 }
  0x13   :  { %212 = vmatmul.msk.f32.vlgmr.msra.gmra.mxu0 %vm39_vm0, %v15_v10 }
  0x19   :  { %223 = vmatmul.msk.f32.gmra.mxu3 %vm39_vm0, %v26_v11  ;;  %218 = vmatmul.msk.f32.gmra.mxu2 %vm39_vm0, %v21_v12 }
  0x1b   :  { %213 = vmatmul.msk.f32.gmra.mxu0 %vm39_vm0, %v16_v13 }
  0x21   :  { %224 = vmatmul.msk.f32.gmra.mxu3 %vm39_vm0, %v27_v14  ;;  %219 = vmatmul.msk.f32.gmra.mxu2 %vm39_vm0, %v22_v15 }
  0x23   :  { %214 = vmatmul.msk.f32.gmra.mxu0 %vm39_vm0, %v17_v16 }
  0x29   :  { %225 = vmatmul.msk.f32.gmra.mxu3 %vm39_vm0, %v28_v17  ;;  %220 = vmatmul.msk.f32.gmra.mxu2 %vm39_vm0, %v23_v18 }
  0x2b   :  { %215 = vmatmul.msk.f32.gmra.mxu0 %vm39_vm0, %v18_v19 }
  0x31   :  { %226 = vmatmul.msk.f32.gmra.mxu3 %vm39_vm0, %v29_v20  ;;  %221 = vmatmul.msk.f32.gmra.mxu2 %vm39_vm0, %v24_v21 }
  0x33   :  { %216 = vmatmul.msk.f32.gmra.mxu0 %vm39_vm0, %v19_v22 }
  0x39   :  { %227 = vmatmul.msk.f32.gmra.mxu3 %vm39_vm0, %v30_v23 }
  0x90   :  { %v105_v29 = vpop.f32.mrf.mxu0 }
  0x91   :  { %v153_v55 = vmul.f32 %v105_v29, %v105_v29 }
  0x94   :  { %v135_v24 = vpop.f32.mrf.mxu3  ;;  %v120_v26 = vpop.f32.mrf.mxu2 }
  0x95   :  { %v163_v44 = vmul.f32 %v135_v24, %v135_v24  ;;  %v158_v50 = vmul.f32 %v120_v26, %v120_v26 }
  0x98   :  { %v108_v32 = vpop.f32.mrf.mxu0 }
  0x99   :  { %v154_v54 = vmul.f32 %v108_v32, %v108_v32 }
  0x9c   :  { %v138_v25 = vpop.f32.mrf.mxu3  ;;  %v123_v28 = vpop.f32.mrf.mxu2 }
  0x9d   :  { %v164_v43 = vmul.f32 %v138_v25, %v138_v25  ;;  %v159_v49 = vmul.f32 %v123_v28, %v123_v28 }
  0xa0   :  { %v111_v35 = vpop.f32.mrf.mxu0 }
  0xa1   :  { %v155_v53 = vmul.f32 %v111_v35, %v111_v35 }
  0xa4   :  { %v141_v27 = vpop.f32.mrf.mxu3  ;;  %v126_v31 = vpop.f32.mrf.mxu2 }
  0xa5   :  { %v165_v40 = vmul.f32 %v141_v27, %v141_v27  ;;  %v160_v47 = vmul.f32 %v126_v31, %v126_v31 }
  0xa8   :  { %v114_v42 = vpop.f32.mrf.mxu0 }
  0xa9   :  { %v156_v52 = vmul.f32 %v114_v42, %v114_v42 }
  0xac   :  { %v144_v30 = vpop.f32.mrf.mxu3  ;;  %v129_v34 = vpop.f32.mrf.mxu2 }
  0xad   :  { %v166_v39 = vmul.f32 %v144_v30, %v144_v30  ;;  %v161_v46 = vmul.f32 %v129_v34, %v129_v34 }
  0xb0   :  { %v117_v48 = vpop.f32.mrf.mxu0 }
  0xb1   :  { %v157_v51 = vmul.f32 %v117_v48, %v117_v48 }
  0xb4   :  { %v147_v33 = vpop.f32.mrf.mxu3  ;;  %v132_v41 = vpop.f32.mrf.mxu2 }
  0xb5   :  { %v167_v38 = vmul.f32 %v147_v33, %v147_v33  ;;  %v162_v45 = vmul.f32 %v132_v41, %v132_v41 }
  0xbc   :  { %v150_v36 = vpop.f32.mrf.mxu3 }
  0xbd   :  { %v168_v37 = vmul.f32 %v150_v36, %v150_v36 }
  0xbf   :  { %170 = vmatpush.msra.mxu1 %v168_v37 }
  0xc1   :  { %171 = vmatpush.msra.mxu1 %v167_v38 }
  0xc3   :  { %172 = vmatpush.msra.mxu1 %v166_v39 }
  0xc5   :  { %173 = vmatpush.msra.mxu1 %v165_v40 }
  0xc7   :  { %174 = vmatpush.msra.mxu1 %v164_v43 }
  0xc9   :  { %175 = vmatpush.msra.mxu1 %v163_v44 }
  0xcb   :  { %176 = vmatpush.msra.mxu1 %v162_v45 }
  0xcd   :  { %177 = vmatpush.msra.mxu1 %v161_v46 }
  0xcf   :  { %178 = vmatpush.msra.mxu1 %v160_v47 }
  0xd1   :  { %179 = vmatpush.msra.mxu1 %v159_v49 }
  0xd3   :  { %180 = vmatpush.msra.mxu1 %v158_v50 }
  0xd5   :  { %181 = vmatpush.msra.mxu1 %v157_v51 }
  0xd7   :  { %182 = vmatpush.msra.mxu1 %v156_v52 }
  0xd9   :  { %183 = vmatpush.msra.mxu1 %v155_v53 }
  0xdb   :  { %184 = vmatpush.msra.mxu1 %v154_v54 }
  0xdd   :  { %185 = vmatpush.msra.mxu1 %v153_v55 }
  0xde   :  { %186 = vmatmul.f32.vlgmr.msra.gmra.mxu1 %v169_v56 }
 0x15b   :  { %v187_v57 = vpop.f32.mrf.mxu1 }
 0x15c   :  { %v190_v58 = vmax.f32 %v187_v57, 1e-10 }
 0x15e   :  { %245 = vlog2.f32 %v190_v58 }
 0x164   :  { %v246_v59 = vpop.eup %245 }
 0x165   :  { %v192_v60 = vmul.f32 0.6931472, %v246_v59 }
 0x167   :  { %v193_v61 = vmul.f32 4.3429227, %v192_v60 }
 0x169   :  { %195 = vst [vmem:[#allocation2] sm:$0xff] %v193_v61 }
 0x16a   :  { %206 = dma.vmem_to_hbm [thread:$0]  %s202_s6, 128, %s204_s9, [#allocation3]  }
 0x16b   :  { %271 = dma.done.wait [#allocation3], 128  }
 0x16c   :  { %272 = vsyncadd [#allocation3], 4294967168 }
 0x16d   :  { %211 = vsyncpa [#allocation3], 1 }

</bundles_post_ra>
